<compile_context>
chip_gen: v5e
topology: v5e:2x2
jax: 0.10.0
libtpu: 0.0.40
codegen_flags: <defaults>
</compile_context>

<pallas_src>
import math
import jax
import jax.numpy as jnp
from jax.experimental import pallas as pl
from jax.experimental.pallas import tpu as pltpu

LANE = 128
SUBLANE = 8
N_LAYERS = 8


def _round_up(x, m):
    return (x + m - 1) // m * m


# ----------------------------- Pallas kernel --------------------------------
def mlp_kernel(x_ref, w_ref, shift_ref, o_ref):
    # x_ref:     (tb, D)      activation tile (lane-dense, zero-padded cols)
    # w_ref:     (8, D, D)    BN-folded, zero-padded weight stack (VMEM-resident)
    # shift_ref: (8, 1, D)    folded bias/BN shift stack (layer 8 slot = b8)
    h = x_ref[...]
    # Layers 1..7: matmul (MXU) + shift + relu (VPU).  Static unroll.
    for l in range(N_LAYERS - 1):
        h = jnp.dot(h, w_ref[l], preferred_element_type=jnp.float32)
        h = jnp.maximum(h + shift_ref[l], 0.0)
    # Layer 8: matmul + bias + sigmoid (EUP), unmasked lane-dense store.
    logits = jnp.dot(h, w_ref[N_LAYERS - 1], preferred_element_type=jnp.float32)
    o_ref[...] = jax.nn.sigmoid(logits + shift_ref[N_LAYERS - 1])


# ------------------------------ Parameters ----------------------------------
def xavier_uniform(key, fan_in, fan_out):
    # torch.nn.init.xavier_uniform_ : U(-a, a), a = sqrt(6 / (fan_in + fan_out))
    a = math.sqrt(6.0 / (fan_in + fan_out))
    # stored pre-transposed as (fan_in, fan_out) so the kernel does h @ W
    return jax.random.uniform(key, (fan_in, fan_out), jnp.float32, -a, a)


def linear_bias(key, fan_in, fan_out):
    # torch default bias init: U(-1/sqrt(fan_in), 1/sqrt(fan_in))
    bound = 1.0 / math.sqrt(fan_in)
    return jax.random.uniform(key, (fan_out,), jnp.float32, -bound, bound)


def make_params(key, n_input, n_hid, n_output, eps=1e-5):
    """Build BN-folded, lane-padded, stacked parameters.

    Returns (w_stack, shift_stack, D):
      w_stack     : (8, D, D)  all layer weights, zero-padded, BN scale folded
      shift_stack : (8, 1, D)  folded shift for layers 1..7, raw bias for layer 8
      D           : padded feature width (multiple of 128)
    """
    dims = [(n_input, n_hid)] + [(n_hid, n_hid)] * 6 + [(n_hid, n_output)]
    keys = jax.random.split(key, 2 * len(dims))
    raw = []
    for i, (fi, fo) in enumerate(dims):
        w = xavier_uniform(keys[2 * i], fi, fo)
        b = linear_bias(keys[2 * i + 1], fi, fo)
        raw.append((w, b))

    # Fold eval-mode BatchNorm1d (gamma=1, beta=0, mean=0, var=1) into layers 1..7.
    folded = []
    for (w, b) in raw[:7]:
        n = w.shape[1]
        gamma = jnp.ones((n,), jnp.float32)
        beta = jnp.zeros((n,), jnp.float32)
        run_mean = jnp.zeros((n,), jnp.float32)
        run_var = jnp.ones((n,), jnp.float32)
        scale = gamma / jnp.sqrt(run_var + eps)
        folded.append((w * scale[None, :], beta + (b - run_mean) * scale))
    folded.append(raw[7])  # final layer: plain linear (sigmoid applied in kernel)

    # One lane-dense width for every layer; zero padding is exact
    # (padded columns stay 0 through relu, padded rows multiply by 0).
    D = _round_up(max(n_input, n_hid, n_output), LANE)
    w_stack = jnp.zeros((N_LAYERS, D, D), jnp.float32)
    shift_stack = jnp.zeros((N_LAYERS, 1, D), jnp.float32)
    for l, (w, b) in enumerate(folded):
        fi, fo = w.shape
        w_stack = w_stack.at[l, :fi, :fo].set(w)
        shift_stack = shift_stack.at[l, 0, :fo].set(b)
    return w_stack, shift_stack, D


# ------------------------------- Wrapper -------------------------------------
def net_forward(x, params, n_output, *, tile_b=128):
    w_stack, shift_stack, D = params
    batch, n_in = x.shape

    # Batch tile: multiple of 8 sublanes, capped at tile_b; pad batch so the
    # grid is exact.  Feature dim padded to D (zero cols match zero W rows).
    tb = min(tile_b, _round_up(batch, SUBLANE))
    b_pad = _round_up(batch, tb)
    x_pad = jnp.zeros((b_pad, D), jnp.float32).at[:batch, :n_in].set(x)

    grid = (b_pad // tb,)
    out = pl.pallas_call(
        mlp_kernel,
        out_shape=jax.ShapeDtypeStruct((b_pad, D), jnp.float32),
        grid_spec=pltpu.PrefetchScalarGridSpec(
            num_scalar_prefetch=0,
            grid=grid,
            in_specs=[
                pl.BlockSpec((tb, D), lambda i: (i, 0)),               # x tile
                pl.BlockSpec(w_stack.shape, lambda i: (0, 0, 0)),      # weight stack
                pl.BlockSpec(shift_stack.shape, lambda i: (0, 0, 0)),  # shift stack
            ],
            out_specs=pl.BlockSpec((tb, D), lambda i: (i, 0)),
        ),
        compiler_params=pltpu.CompilerParams(
            dimension_semantics=("parallel",)),   # v7x: shard batch over 2 TCs
    )(x_pad, w_stack, shift_stack)

    return out[:batch, :n_output]


# ---------------------------- Reference (JAX) --------------------------------
def net_forward_ref(x, params, n_output):
    w_stack, shift_stack, D = params
    batch, n_in = x.shape
    h = jnp.zeros((batch, D), jnp.float32).at[:, :n_in].set(x)
    for l in range(N_LAYERS - 1):
        h = jnp.maximum(h @ w_stack[l] + shift_stack[l], 0.0)
    out = jax.nn.sigmoid(h @ w_stack[N_LAYERS - 1] + shift_stack[N_LAYERS - 1])
    return out[:, :n_output]


if __name__ == "__main__":
    batch, n_input, n_hid, n_output = 8, 16, 32, 8

    key = jax.random.PRNGKey(0)
    key_x, key_p = jax.random.split(key)
    x = jax.random.normal(key_x, (batch, n_input), jnp.float32)
    params = make_params(key_p, n_input, n_hid, n_output)

    out = net_forward(x, params, n_output)
    out = jax.block_until_ready(out)

    ref = net_forward_ref(x, params, n_output)
    assert out.shape == (batch, n_output)
    assert jnp.allclose(out, ref, atol=1e-5, rtol=1e-5), "mismatch vs JAX reference"

    print("KERNEL_OK")
</pallas_src>

<mosaic_0001>
module attributes {stable_mosaic.version = 11 : i64} {
  func.func @mlp_kernel(%arg0: i32, %arg1: memref<8x128xf32, #tpu.memory_space<vmem>>, %arg2: memref<8x128x128xf32, #tpu.memory_space<vmem>>, %arg3: memref<8x1x128xf32, #tpu.memory_space<vmem>>, %arg4: memref<8x128xf32, #tpu.memory_space<vmem>>) attributes {dimension_semantics = [#tpu.dimension_semantics<parallel>], iteration_bounds = array<i64: 1>, scalar_prefetch = 0 : i64, scratch_operands = 0 : i64, tpu.core_type = #tpu.core_type<tc>, window_params = [{transform_indices = @transform_0, window_bounds = array<i64: 8, 128>}, {pipeline_mode = #tpu.pipeline_mode<synchronous>, transform_indices = @transform_1, window_bounds = array<i64: 8, 128, 128>}, {pipeline_mode = #tpu.pipeline_mode<synchronous>, transform_indices = @transform_2, window_bounds = array<i64: 8, 1, 128>}, {transform_indices = @transform_3, window_bounds = array<i64: 8, 128>}]} {
    %c0 = arith.constant 0 : index
    %c0_0 = arith.constant 0 : index
    %0 = vector.load %arg1[%c0, %c0_0] : memref<8x128xf32, #tpu.memory_space<vmem>>, vector<8x128xf32>
    %c0_1 = arith.constant 0 : index
    %c0_2 = arith.constant 0 : index
    %c0_3 = arith.constant 0 : index
    %1 = vector.load %arg2[%c0_1, %c0_2, %c0_3] : memref<8x128x128xf32, #tpu.memory_space<vmem>>, vector<1x128x128xf32>
    %2 = vector.shape_cast %1 : vector<1x128x128xf32> to vector<128x128xf32>
    %cst = arith.constant dense<0.000000e+00> : vector<8x128xf32>
    %3 = tpu.matmul %0, %2, %cst {dimension_numbers = #tpu.dot_dimension_numbers<[1], [0], [0], [1], [0, 0, 1, 1], [], []>} : vector<8x128xf32>, vector<128x128xf32>, vector<8x128xf32> -> vector<8x128xf32>
    %c0_4 = arith.constant 0 : index
    %c0_5 = arith.constant 0 : index
    %c0_6 = arith.constant 0 : index
    %4 = vector.load %arg3[%c0_4, %c0_5, %c0_6] : memref<8x1x128xf32, #tpu.memory_space<vmem>>, vector<1x1x128xf32>
    %5 = vector.shape_cast %4 : vector<1x1x128xf32> to vector<1x128xf32>
    %6 = vector.broadcast %5 : vector<1x128xf32> to vector<8x128xf32>
    %7 = arith.addf %3, %6 : vector<8x128xf32>
    %cst_7 = arith.constant 0.000000e+00 : f32
    %8 = vector.broadcast %cst_7 : f32 to vector<8x128xf32>
    %9 = arith.maximumf %7, %8 : vector<8x128xf32>
    %c1 = arith.constant 1 : index
    %c0_8 = arith.constant 0 : index
    %c0_9 = arith.constant 0 : index
    %10 = vector.load %arg2[%c1, %c0_8, %c0_9] : memref<8x128x128xf32, #tpu.memory_space<vmem>>, vector<1x128x128xf32>
    %11 = vector.shape_cast %10 : vector<1x128x128xf32> to vector<128x128xf32>
    %cst_10 = arith.constant dense<0.000000e+00> : vector<8x128xf32>
    %12 = tpu.matmul %9, %11, %cst_10 {dimension_numbers = #tpu.dot_dimension_numbers<[1], [0], [0], [1], [0, 0, 1, 1], [], []>} : vector<8x128xf32>, vector<128x128xf32>, vector<8x128xf32> -> vector<8x128xf32>
    %c1_11 = arith.constant 1 : index
    %c0_12 = arith.constant 0 : index
    %c0_13 = arith.constant 0 : index
    %13 = vector.load %arg3[%c1_11, %c0_12, %c0_13] : memref<8x1x128xf32, #tpu.memory_space<vmem>>, vector<1x1x128xf32>
    %14 = vector.shape_cast %13 : vector<1x1x128xf32> to vector<1x128xf32>
    %15 = vector.broadcast %14 : vector<1x128xf32> to vector<8x128xf32>
    %16 = arith.addf %12, %15 : vector<8x128xf32>
    %cst_14 = arith.constant 0.000000e+00 : f32
    %17 = vector.broadcast %cst_14 : f32 to vector<8x128xf32>
    %18 = arith.maximumf %16, %17 : vector<8x128xf32>
    %c2 = arith.constant 2 : index
    %c0_15 = arith.constant 0 : index
    %c0_16 = arith.constant 0 : index
    %19 = vector.load %arg2[%c2, %c0_15, %c0_16] : memref<8x128x128xf32, #tpu.memory_space<vmem>>, vector<1x128x128xf32>
    %20 = vector.shape_cast %19 : vector<1x128x128xf32> to vector<128x128xf32>
    %cst_17 = arith.constant dense<0.000000e+00> : vector<8x128xf32>
    %21 = tpu.matmul %18, %20, %cst_17 {dimension_numbers = #tpu.dot_dimension_numbers<[1], [0], [0], [1], [0, 0, 1, 1], [], []>} : vector<8x128xf32>, vector<128x128xf32>, vector<8x128xf32> -> vector<8x128xf32>
    %c2_18 = arith.constant 2 : index
    %c0_19 = arith.constant 0 : index
    %c0_20 = arith.constant 0 : index
    %22 = vector.load %arg3[%c2_18, %c0_19, %c0_20] : memref<8x1x128xf32, #tpu.memory_space<vmem>>, vector<1x1x128xf32>
    %23 = vector.shape_cast %22 : vector<1x1x128xf32> to vector<1x128xf32>
    %24 = vector.broadcast %23 : vector<1x128xf32> to vector<8x128xf32>
    %25 = arith.addf %21, %24 : vector<8x128xf32>
    %cst_21 = arith.constant 0.000000e+00 : f32
    %26 = vector.broadcast %cst_21 : f32 to vector<8x128xf32>
    %27 = arith.maximumf %25, %26 : vector<8x128xf32>
    %c3 = arith.constant 3 : index
    %c0_22 = arith.constant 0 : index
    %c0_23 = arith.constant 0 : index
    %28 = vector.load %arg2[%c3, %c0_22, %c0_23] : memref<8x128x128xf32, #tpu.memory_space<vmem>>, vector<1x128x128xf32>
    %29 = vector.shape_cast %28 : vector<1x128x128xf32> to vector<128x128xf32>
    %cst_24 = arith.constant dense<0.000000e+00> : vector<8x128xf32>
    %30 = tpu.matmul %27, %29, %cst_24 {dimension_numbers = #tpu.dot_dimension_numbers<[1], [0], [0], [1], [0, 0, 1, 1], [], []>} : vector<8x128xf32>, vector<128x128xf32>, vector<8x128xf32> -> vector<8x128xf32>
    %c3_25 = arith.constant 3 : index
    %c0_26 = arith.constant 0 : index
    %c0_27 = arith.constant 0 : index
    %31 = vector.load %arg3[%c3_25, %c0_26, %c0_27] : memref<8x1x128xf32, #tpu.memory_space<vmem>>, vector<1x1x128xf32>
    %32 = vector.shape_cast %31 : vector<1x1x128xf32> to vector<1x128xf32>
    %33 = vector.broadcast %32 : vector<1x128xf32> to vector<8x128xf32>
    %34 = arith.addf %30, %33 : vector<8x128xf32>
    %cst_28 = arith.constant 0.000000e+00 : f32
    %35 = vector.broadcast %cst_28 : f32 to vector<8x128xf32>
    %36 = arith.maximumf %34, %35 : vector<8x128xf32>
    %c4 = arith.constant 4 : index
    %c0_29 = arith.constant 0 : index
    %c0_30 = arith.constant 0 : index
    %37 = vector.load %arg2[%c4, %c0_29, %c0_30] : memref<8x128x128xf32, #tpu.memory_space<vmem>>, vector<1x128x128xf32>
    %38 = vector.shape_cast %37 : vector<1x128x128xf32> to vector<128x128xf32>
    %cst_31 = arith.constant dense<0.000000e+00> : vector<8x128xf32>
    %39 = tpu.matmul %36, %38, %cst_31 {dimension_numbers = #tpu.dot_dimension_numbers<[1], [0], [0], [1], [0, 0, 1, 1], [], []>} : vector<8x128xf32>, vector<128x128xf32>, vector<8x128xf32> -> vector<8x128xf32>
    %c4_32 = arith.constant 4 : index
    %c0_33 = arith.constant 0 : index
    %c0_34 = arith.constant 0 : index
    %40 = vector.load %arg3[%c4_32, %c0_33, %c0_34] : memref<8x1x128xf32, #tpu.memory_space<vmem>>, vector<1x1x128xf32>
    %41 = vector.shape_cast %40 : vector<1x1x128xf32> to vector<1x128xf32>
    %42 = vector.broadcast %41 : vector<1x128xf32> to vector<8x128xf32>
    %43 = arith.addf %39, %42 : vector<8x128xf32>
    %cst_35 = arith.constant 0.000000e+00 : f32
    %44 = vector.broadcast %cst_35 : f32 to vector<8x128xf32>
    %45 = arith.maximumf %43, %44 : vector<8x128xf32>
    %c5 = arith.constant 5 : index
    %c0_36 = arith.constant 0 : index
    %c0_37 = arith.constant 0 : index
    %46 = vector.load %arg2[%c5, %c0_36, %c0_37] : memref<8x128x128xf32, #tpu.memory_space<vmem>>, vector<1x128x128xf32>
    %47 = vector.shape_cast %46 : vector<1x128x128xf32> to vector<128x128xf32>
    %cst_38 = arith.constant dense<0.000000e+00> : vector<8x128xf32>
    %48 = tpu.matmul %45, %47, %cst_38 {dimension_numbers = #tpu.dot_dimension_numbers<[1], [0], [0], [1], [0, 0, 1, 1], [], []>} : vector<8x128xf32>, vector<128x128xf32>, vector<8x128xf32> -> vector<8x128xf32>
    %c5_39 = arith.constant 5 : index
    %c0_40 = arith.constant 0 : index
    %c0_41 = arith.constant 0 : index
    %49 = vector.load %arg3[%c5_39, %c0_40, %c0_41] : memref<8x1x128xf32, #tpu.memory_space<vmem>>, vector<1x1x128xf32>
    %50 = vector.shape_cast %49 : vector<1x1x128xf32> to vector<1x128xf32>
    %51 = vector.broadcast %50 : vector<1x128xf32> to vector<8x128xf32>
    %52 = arith.addf %48, %51 : vector<8x128xf32>
    %cst_42 = arith.constant 0.000000e+00 : f32
    %53 = vector.broadcast %cst_42 : f32 to vector<8x128xf32>
    %54 = arith.maximumf %52, %53 : vector<8x128xf32>
    %c6 = arith.constant 6 : index
    %c0_43 = arith.constant 0 : index
    %c0_44 = arith.constant 0 : index
    %55 = vector.load %arg2[%c6, %c0_43, %c0_44] : memref<8x128x128xf32, #tpu.memory_space<vmem>>, vector<1x128x128xf32>
    %56 = vector.shape_cast %55 : vector<1x128x128xf32> to vector<128x128xf32>
    %cst_45 = arith.constant dense<0.000000e+00> : vector<8x128xf32>
    %57 = tpu.matmul %54, %56, %cst_45 {dimension_numbers = #tpu.dot_dimension_numbers<[1], [0], [0], [1], [0, 0, 1, 1], [], []>} : vector<8x128xf32>, vector<128x128xf32>, vector<8x128xf32> -> vector<8x128xf32>
    %c6_46 = arith.constant 6 : index
    %c0_47 = arith.constant 0 : index
    %c0_48 = arith.constant 0 : index
    %58 = vector.load %arg3[%c6_46, %c0_47, %c0_48] : memref<8x1x128xf32, #tpu.memory_space<vmem>>, vector<1x1x128xf32>
    %59 = vector.shape_cast %58 : vector<1x1x128xf32> to vector<1x128xf32>
    %60 = vector.broadcast %59 : vector<1x128xf32> to vector<8x128xf32>
    %61 = arith.addf %57, %60 : vector<8x128xf32>
    %cst_49 = arith.constant 0.000000e+00 : f32
    %62 = vector.broadcast %cst_49 : f32 to vector<8x128xf32>
    %63 = arith.maximumf %61, %62 : vector<8x128xf32>
    %c7 = arith.constant 7 : index
    %c0_50 = arith.constant 0 : index
    %c0_51 = arith.constant 0 : index
    %64 = vector.load %arg2[%c7, %c0_50, %c0_51] : memref<8x128x128xf32, #tpu.memory_space<vmem>>, vector<1x128x128xf32>
    %65 = vector.shape_cast %64 : vector<1x128x128xf32> to vector<128x128xf32>
    %cst_52 = arith.constant dense<0.000000e+00> : vector<8x128xf32>
    %66 = tpu.matmul %63, %65, %cst_52 {dimension_numbers = #tpu.dot_dimension_numbers<[1], [0], [0], [1], [0, 0, 1, 1], [], []>} : vector<8x128xf32>, vector<128x128xf32>, vector<8x128xf32> -> vector<8x128xf32>
    %c7_53 = arith.constant 7 : index
    %c0_54 = arith.constant 0 : index
    %c0_55 = arith.constant 0 : index
    %67 = vector.load %arg3[%c7_53, %c0_54, %c0_55] : memref<8x1x128xf32, #tpu.memory_space<vmem>>, vector<1x1x128xf32>
    %68 = vector.shape_cast %67 : vector<1x1x128xf32> to vector<1x128xf32>
    %69 = vector.broadcast %68 : vector<1x128xf32> to vector<8x128xf32>
    %70 = arith.addf %66, %69 : vector<8x128xf32>
    %71 = arith.negf %70 : vector<8x128xf32>
    %72 = math.exp %71 : vector<8x128xf32>
    %cst_56 = arith.constant 1.000000e+00 : f32
    %73 = vector.broadcast %cst_56 : f32 to vector<8x128xf32>
    %74 = arith.addf %73, %72 : vector<8x128xf32>
    %75 = arith.divf %73, %74 : vector<8x128xf32>
    %c0_57 = arith.constant 0 : index
    %c0_58 = arith.constant 0 : index
    %76 = vector.load %arg4[%c0_57, %c0_58] : memref<8x128xf32, #tpu.memory_space<vmem>>, vector<8x128xf32>
    tpu.vector_store %arg4[%c0_57, %c0_58], %75 {strides = array<i32>} : memref<8x128xf32, #tpu.memory_space<vmem>>, vector<8x128xf32>,
    return
  }
  func.func @transform_0(%arg0: i32) -> (i32, i32) {
    %c0_i32 = arith.constant 0 : i32
    %c0_i32_0 = arith.constant 0 : i32
    return %arg0, %c0_i32 : i32, i32
  }
  func.func @transform_1(%arg0: i32) -> (i32, i32, i32) {
    %c0_i32 = arith.constant 0 : i32
    %c0_i32_0 = arith.constant 0 : i32
    %c0_i32_1 = arith.constant 0 : i32
    %c0_i32_2 = arith.constant 0 : i32
    return %c0_i32, %c0_i32_0, %c0_i32_1 : i32, i32, i32
  }
  func.func @transform_2(%arg0: i32) -> (i32, i32, i32) {
    %c0_i32 = arith.constant 0 : i32
    %c0_i32_0 = arith.constant 0 : i32
    %c0_i32_1 = arith.constant 0 : i32
    %c0_i32_2 = arith.constant 0 : i32
    return %c0_i32, %c0_i32_0, %c0_i32_1 : i32, i32, i32
  }
  func.func @transform_3(%arg0: i32) -> (i32, i32) {
    %c0_i32 = arith.constant 0 : i32
    %c0_i32_0 = arith.constant 0 : i32
    return %arg0, %c0_i32 : i32, i32
  }
}

</mosaic_0001>

<bundles_post_ra>
// kernel: tpu_custom_call.1
= control target key start
LH: loop header
LB: loop body
LE: loop exit
PB: predicated region body
PF: predicated region fallthrough
CT: control target
= control target key end

     0   :  { %8 = vsyncpa [#allocation3], 0  ;;  %s603_s0 = inlined_call_operand.hbm [shape: f32[8,128], index: 0, kind: input, shape index: {}]   ;;  %s604_s1 = inlined_call_operand.hbm [shape: f32[8,128,128], index: 1, kind: input, shape index: {}]   ;;  %s605_s2 = inlined_call_operand.hbm [shape: f32[8,1,128], index: 2, kind: input, shape index: {}]   ;;  %s606_s3 = inlined_call_operand.hbm [shape: f32[8,128], index: 3, kind: output, shape index: {}]  }
   0x1   :  { %9 = vsyncpa [#allocation6], 0  ;;  %s26_s14 = sshll.u32 %s604_s1, 4  ;;  %s27_s14 = int_to_ptr.hbm [resolvable:$true] %s26_s14 }
   0x2   :  { %10 = vsyncpa [#allocation4], 0  ;;  %s563_s15 = smov [#allocation5]   ;;  %s16_s19 = sshll.u32 %s603_s0, 4  ;;  %s17_s19 = int_to_ptr.hbm [resolvable:$true] %s16_s19 }
   0x3   :  { %s28_s16 = sshll.u32 %s563_s15, 4  ;;  %s564_s20 = smov 128   ;;  %s29_s16 = int_to_ptr.vmem [resolvable:$true] %s28_s16 }
   0x4   :  { %s565_s21 = smov 8   ;;  %s566_s22 = smov [#allocation2]  }
   0x5   :  { %34 = dma.hbm_to_vmem [thread:$0]  %s27_s14, 16384, %s29_s16, [#allocation6], %s564_s20, %s564_s20, %s565_s21  }
   0x6   :  { %s18_s23 = sshll.u32 %s566_s22, 4  ;;  %s39_s26 = sshll.u32 %s605_s2, 4  ;;  %s19_s23 = int_to_ptr.vmem [resolvable:$true] %s18_s23  ;;  %s40_s26 = int_to_ptr.hbm [resolvable:$true] %s39_s26 }
   0x7   :  { %21 = dma.hbm_to_vmem [thread:$0]  %s17_s19, 128, %s19_s23, [#allocation3]  }
   0x8   :  { %s567_s1 = smov [#allocation7]   ;;  %s568_s28 = smov 16  }
   0x9   :  { %s41_s27 = sshll.u32 %s567_s1, 4  ;;  %s569_s29 = smov 1   ;;  %s42_s27 = int_to_ptr.vmem [resolvable:$true] %s41_s27 }
   0xa   :  { %47 = dma.hbm_to_vmem [thread:$0]  %s40_s26, 128, %s42_s27, [#allocation6], %s568_s28, %s568_s28, %s569_s29  }
   0xb   :  { %557 = dma.done.wait [#allocation3], 128  }
   0xc   :  { %558 = vsyncadd [#allocation3], 4294967168 }
   0xd   :  { %559 = dma.done.wait [#allocation6], 16512  }
   0xe   :  { %560 = vsyncadd [#allocation6], 4294950784  ;;  %v76_v0 = vld [vmem:[#allocation5 + $0x78] sm:$0xff]  ;;  %v75_v1 = vld [vmem:[#allocation5 + $0x70] sm:$0xff]  ;;  %s570_s0 = smov [#allocation8]   ;;  %s429_s5 = sshll.u32 %s606_s3, 4  ;;  %s430_s5 = int_to_ptr.hbm [resolvable:$true] %s429_s5 }
   0xf   :  { %81 = vmatpush.msra.mxu0 %v76_v0  ;;  %v74_v2 = vld [vmem:[#allocation5 + $0x68] sm:$0xff]  ;;  %v73_v3 = vld [vmem:[#allocation5 + $0x60] sm:$0xff]  ;;  %v118_v4 = vld [vmem:[#allocation5 + $0xf8] sm:$0xff]  ;;  %s427_s2 = sshll.u32 %s570_s0, 4  ;;  %s428_s2 = int_to_ptr.vmem [resolvable:$true] %s427_s2 }
  0x10   :  { %v72_v5 = vld [vmem:[#allocation5 + $0x58] sm:$0xff]  ;;  %124 = vmatpush.msra.mxu1 %v118_v4  ;;  %v117_v6 = vld [vmem:[#allocation5 + $0xf0] sm:$0xff]  ;;  %v116_v7 = vld [vmem:[#allocation5 + $0xe8] sm:$0xff] }
  0x11   :  { %82 = vmatpush.msra.mxu0 %v75_v1  ;;  %v71_v8 = vld [vmem:[#allocation5 + $0x50] sm:$0xff]  ;;  %v70_v9 = vld [vmem:[#allocation5 + $0x48] sm:$0xff]  ;;  %v115_v10 = vld [vmem:[#allocation5 + $0xe0] sm:$0xff] }
  0x12   :  { %125 = vmatpush.msra.mxu1 %v117_v6  ;;  %v69_v11 = vld [vmem:[#allocation5 + $0x40] sm:$0xff]  ;;  %v114_v12 = vld [vmem:[#allocation5 + $0xd8] sm:$0xff]  ;;  %v113_v13 = vld [vmem:[#allocation5 + $0xd0] sm:$0xff] }
  0x13   :  { %83 = vmatpush.msra.mxu0 %v74_v2  ;;  %v68_v14 = vld [vmem:[#allocation5 + $0x38] sm:$0xff]  ;;  %v112_v15 = vld [vmem:[#allocation5 + $0xc8] sm:$0xff]  ;;  %v67_v16 = vld [vmem:[#allocation5 + $0x30] sm:$0xff] }
  0x14   :  { %126 = vmatpush.msra.mxu1 %v116_v7  ;;  %v111_v17 = vld [vmem:[#allocation5 + $0xc0] sm:$0xff]  ;;  %v66_v18 = vld [vmem:[#allocation5 + $0x28] sm:$0xff]  ;;  %v110_v19 = vld [vmem:[#allocation5 + $0xb8] sm:$0xff] }
  0x15   :  { %84 = vmatpush.msra.mxu0 %v73_v3  ;;  %v65_v20 = vld [vmem:[#allocation5 + $0x20] sm:$0xff]  ;;  %v109_v21 = vld [vmem:[#allocation5 + $0xb0] sm:$0xff]  ;;  %v64_v22 = vld [vmem:[#allocation5 + $0x18] sm:$0xff] }
  0x16   :  { %127 = vmatpush.msra.mxu1 %v115_v10  ;;  %v108_v23 = vld [vmem:[#allocation5 + $0xa8] sm:$0xff]  ;;  %v63_v24 = vld [vmem:[#allocation5 + $0x10] sm:$0xff]  ;;  %v107_v25 = vld [vmem:[#allocation5 + $0xa0] sm:$0xff] }
  0x17   :  { %85 = vmatpush.msra.mxu0 %v72_v5  ;;  %v62_v26 = vld [vmem:[#allocation5 + $0x8] sm:$0xff]  ;;  %v106_v27 = vld [vmem:[#allocation5 + $0x98] sm:$0xff]  ;;  %v61_v28 = vld [vmem:[#allocation5] sm:$0xff] }
  0x18   :  { %128 = vmatpush.msra.mxu1 %v114_v12  ;;  %v60_v29 = vld [vmem:[#allocation2] sm:$0xff]  ;;  %v105_v30 = vld [vmem:[#allocation5 + $0x90] sm:$0xff]  ;;  %v104_v31 = vld [vmem:[#allocation5 + $0x88] sm:$0xff] }
  0x19   :  { %86 = vmatpush.msra.mxu0 %v71_v8  ;;  %v103_v32 = vld [vmem:[#allocation5 + $0x80] sm:$0xff]  ;;  %v161_v33 = vld [vmem:[#allocation5 + $0x178] sm:$0xff]  ;;  %v160_v34 = vld [vmem:[#allocation5 + $0x170] sm:$0xff] }
  0x1a   :  { %129 = vmatpush.msra.mxu1 %v113_v13  ;;  %167 = vmatpush.msra.mxu2 %v161_v33  ;;  %v159_v35 = vld [vmem:[#allocation5 + $0x168] sm:$0xff]  ;;  %v158_v36 = vld [vmem:[#allocation5 + $0x160] sm:$0xff]  ;;  %v157_v37 = vld [vmem:[#allocation5 + $0x158] sm:$0xff] }
  0x1b   :  { %87 = vmatpush.msra.mxu0 %v70_v9  ;;  %v156_v38 = vld [vmem:[#allocation5 + $0x150] sm:$0xff]  ;;  %v155_v39 = vld [vmem:[#allocation5 + $0x148] sm:$0xff]  ;;  %v154_v40 = vld [vmem:[#allocation5 + $0x140] sm:$0xff] }
  0x1c   :  { %130 = vmatpush.msra.mxu1 %v112_v15  ;;  %168 = vmatpush.msra.mxu2 %v160_v34  ;;  %v153_v41 = vld [vmem:[#allocation5 + $0x138] sm:$0xff]  ;;  %v152_v42 = vld [vmem:[#allocation5 + $0x130] sm:$0xff]  ;;  %v151_v43 = vld [vmem:[#allocation5 + $0x128] sm:$0xff] }
  0x1d   :  { %88 = vmatpush.msra.mxu0 %v69_v11  ;;  %v150_v44 = vld [vmem:[#allocation5 + $0x120] sm:$0xff]  ;;  %v149_v45 = vld [vmem:[#allocation5 + $0x118] sm:$0xff]  ;;  %v148_v50 = vld [vmem:[#allocation5 + $0x110] sm:$0xff] }
  0x1e   :  { %131 = vmatpush.msra.mxu1 %v111_v17  ;;  %169 = vmatpush.msra.mxu2 %v159_v35  ;;  %v449_v46 = vld [vmem:[#allocation7] ss:$0 sm:$0xff]  ;;  %v147_v51 = vld [vmem:[#allocation5 + $0x108] sm:$0xff]  ;;  %v204_v53 = vld [vmem:[#allocation5 + $0x1f8] sm:$0xff] }
  0x1f   :  { %89 = vmatpush.msra.mxu0 %v68_v14  ;;  %v146_v52 = vld [vmem:[#allocation5 + $0x100] sm:$0xff]  ;;  %v203_v54 = vld [vmem:[#allocation5 + $0x1f0] sm:$0xff]  ;;  %210 = vmatpush.msra.mxu3 %v204_v53  ;;  %v202_v55 = vld [vmem:[#allocation5 + $0x1e8] sm:$0xff] }
  0x20   :  { %132 = vmatpush.msra.mxu1 %v110_v19  ;;  %170 = vmatpush.msra.mxu2 %v158_v36  ;;  %v201_v56 = vld [vmem:[#allocation5 + $0x1e0] sm:$0xff]  ;;  %v200_v57 = vld [vmem:[#allocation5 + $0x1d8] sm:$0xff]  ;;  %v199_v58 = vld [vmem:[#allocation5 + $0x1d0] sm:$0xff] }
  0x21   :  { %90 = vmatpush.msra.mxu0 %v67_v16  ;;  %211 = vmatpush.msra.mxu3 %v203_v54  ;;  %v198_v59 = vld [vmem:[#allocation5 + $0x1c8] sm:$0xff]  ;;  %v197_v60 = vld [vmem:[#allocation5 + $0x1c0] sm:$0xff]  ;;  %v196_v61 = vld [vmem:[#allocation5 + $0x1b8] sm:$0xff] }
  0x22   :  { %133 = vmatpush.msra.mxu1 %v109_v21  ;;  %171 = vmatpush.msra.mxu2 %v157_v37  ;;  %v195_v62 = vld [vmem:[#allocation5 + $0x1b0] sm:$0xff]  ;;  %v194_v63 = vld [vmem:[#allocation5 + $0x1a8] sm:$0xff]  ;;  %v193_v0 = vld [vmem:[#allocation5 + $0x1a0] sm:$0xff] }
  0x23   :  { %91 = vmatpush.msra.mxu0 %v66_v18  ;;  %212 = vmatpush.msra.mxu3 %v202_v55  ;;  %v192_v1 = vld [vmem:[#allocation5 + $0x198] sm:$0xff]  ;;  %v450_v2 = vld [vmem:[#allocation7 + $0x1] ss:$0 sm:$0xff]  ;;  %v191_v6 = vld [vmem:[#allocation5 + $0x190] sm:$0xff] }
  0x24   :  { %134 = vmatpush.msra.mxu1 %v108_v23  ;;  %172 = vmatpush.msra.mxu2 %v156_v38  ;;  %v190_v7 = vld [vmem:[#allocation5 + $0x188] sm:$0xff]  ;;  %v189_v8 = vld [vmem:[#allocation5 + $0x180] sm:$0xff]  ;;  %v247_v9 = vld [vmem:[#allocation5 + $0x278] sm:$0xff] }
  0x25   :  { %92 = vmatpush.msra.mxu0 %v65_v20  ;;  %213 = vmatpush.msra.mxu3 %v201_v56  ;;  %v246_v10 = vld [vmem:[#allocation5 + $0x270] sm:$0xff]  ;;  %v245_v11 = vld [vmem:[#allocation5 + $0x268] sm:$0xff]  ;;  %v244_v12 = vld [vmem:[#allocation5 + $0x260] sm:$0xff] }
  0x26   :  { %135 = vmatpush.msra.mxu1 %v107_v25  ;;  %173 = vmatpush.msra.mxu2 %v155_v39  ;;  %v243_v13 = vld [vmem:[#allocation5 + $0x258] sm:$0xff]  ;;  %v242_v14 = vld [vmem:[#allocation5 + $0x250] sm:$0xff]  ;;  %v241_v15 = vld [vmem:[#allocation5 + $0x248] sm:$0xff] }
  0x27   :  { %93 = vmatpush.msra.mxu0 %v64_v22  ;;  %214 = vmatpush.msra.mxu3 %v200_v57  ;;  %v240_v16 = vld [vmem:[#allocation5 + $0x240] sm:$0xff]  ;;  %v239_v17 = vld [vmem:[#allocation5 + $0x238] sm:$0xff]  ;;  %v238_v18 = vld [vmem:[#allocation5 + $0x230] sm:$0xff] }
  0x28   :  { %136 = vmatpush.msra.mxu1 %v106_v27  ;;  %174 = vmatpush.msra.mxu2 %v154_v40  ;;  %v237_v19 = vld [vmem:[#allocation5 + $0x228] sm:$0xff]  ;;  %v236_v20 = vld [vmem:[#allocation5 + $0x220] sm:$0xff]  ;;  %v235_v21 = vld [vmem:[#allocation5 + $0x218] sm:$0xff] }
  0x29   :  { %94 = vmatpush.msra.mxu0 %v63_v24  ;;  %215 = vmatpush.msra.mxu3 %v199_v58  ;;  %v451_v22 = vld [vmem:[#allocation7 + $0x2] ss:$0 sm:$0xff]  ;;  %v233_v27 = vld [vmem:[#allocation5 + $0x208] sm:$0xff]  ;;  %v286_v33 = vld [vmem:[#allocation5 + $0x2d8] sm:$0xff] }
  0x2a   :  { %137 = vmatpush.msra.mxu1 %v105_v30  ;;  %175 = vmatpush.msra.mxu2 %v153_v41  ;;  %v289_v30 = vld [vmem:[#allocation5 + $0x2f0] sm:$0xff]  ;;  %v284_v35 = vld [vmem:[#allocation5 + $0x2c8] sm:$0xff]  ;;  %v283_v36 = vld [vmem:[#allocation5 + $0x2c0] sm:$0xff] }
  0x2b   :  { %95 = vmatpush.msra.mxu0 %v62_v26  ;;  %216 = vmatpush.msra.mxu3 %v198_v59  ;;  %v234_v26 = vld [vmem:[#allocation5 + $0x210] sm:$0xff]  ;;  %v282_v37 = vld [vmem:[#allocation5 + $0x2b8] sm:$0xff]  ;;  %v280_v39 = vld [vmem:[#allocation5 + $0x2a8] sm:$0xff] }
  0x2c   :  { %138 = vmatpush.msra.mxu1 %v104_v31  ;;  %176 = vmatpush.msra.mxu2 %v152_v42  ;;  %v288_v31 = vld [vmem:[#allocation5 + $0x2e8] sm:$0xff]  ;;  %v285_v34 = vld [vmem:[#allocation5 + $0x2d0] sm:$0xff]  ;;  %v279_v40 = vld [vmem:[#allocation5 + $0x2a0] sm:$0xff] }
  0x2d   :  { %96 = vmatpush.msra.mxu0 %v61_v28  ;;  %217 = vmatpush.msra.mxu3 %v197_v60  ;;  %v232_v28 = vld [vmem:[#allocation5 + $0x200] sm:$0xff]  ;;  %v281_v38 = vld [vmem:[#allocation5 + $0x2b0] sm:$0xff]  ;;  %v278_v41 = vld [vmem:[#allocation5 + $0x298] sm:$0xff] }
  0x2e   :  { %97 = vmatmul.f32.vlgmr.msra.gmra.mxu0 %v60_v29  ;;  %139 = vmatpush.msra.mxu1 %v103_v32  ;;  %v290_v29 = vld [vmem:[#allocation5 + $0x2f8] sm:$0xff]  ;;  %v287_v32 = vld [vmem:[#allocation5 + $0x2e0] sm:$0xff]  ;;  %v328_v54 = vld [vmem:[#allocation5 + $0x350] sm:$0xff] }
  0x2f   :  { %177 = vmatpush.msra.mxu2 %v151_v43  ;;  %218 = vmatpush.msra.mxu3 %v196_v61  ;;  %v452_v42 = vld [vmem:[#allocation7 + $0x3] ss:$0 sm:$0xff]  ;;  %v329_v53 = vld [vmem:[#allocation5 + $0x358] sm:$0xff]  ;;  %v327_v55 = vld [vmem:[#allocation5 + $0x348] sm:$0xff] }
  0x30   :  { %253 = vmatpush.msrb.mxu0 %v247_v9  ;;  %296 = vmatpush.msrb.mxu1 %v290_v29  ;;  %v326_v56 = vld [vmem:[#allocation5 + $0x340] sm:$0xff]  ;;  %v325_v57 = vld [vmem:[#allocation5 + $0x338] sm:$0xff]  ;;  %v324_v58 = vld [vmem:[#allocation5 + $0x330] sm:$0xff] }
  0x31   :  { %178 = vmatpush.msra.mxu2 %v150_v44  ;;  %219 = vmatpush.msra.mxu3 %v195_v62  ;;  %v323_v59 = vld [vmem:[#allocation5 + $0x328] sm:$0xff]  ;;  %v322_v60 = vld [vmem:[#allocation5 + $0x320] sm:$0xff]  ;;  %v321_v61 = vld [vmem:[#allocation5 + $0x318] sm:$0xff] }
  0x32   :  { %254 = vmatpush.msrb.mxu0 %v246_v10  ;;  %297 = vmatpush.msrb.mxu1 %v289_v30  ;;  %v453_v62 = vld [vmem:[#allocation7 + $0x4] ss:$0 sm:$0xff]  ;;  %v372_v9 = vld [vmem:[#allocation5 + $0x3d8] sm:$0xff]  ;;  %v371_v10 = vld [vmem:[#allocation5 + $0x3d0] sm:$0xff] }
  0x33   :  { %179 = vmatpush.msra.mxu2 %v149_v45  ;;  %220 = vmatpush.msra.mxu3 %v194_v63  ;;  %v456_v29 = vld [vmem:[#allocation7 + $0x7] ss:$0 sm:$0xff] }
  0x34   :  { %255 = vmatpush.msrb.mxu0 %v245_v11  ;;  %298 = vmatpush.msrb.mxu1 %v288_v31  ;;  %v370_v11 = vld [vmem:[#allocation5 + $0x3c8] sm:$0xff] }
  0x35   :  { %180 = vmatpush.msra.mxu2 %v148_v50  ;;  %221 = vmatpush.msra.mxu3 %v193_v0  ;;  %v332_v50 = vld [vmem:[#allocation5 + $0x370] sm:$0xff] }
  0x36   :  { %256 = vmatpush.msrb.mxu0 %v244_v12  ;;  %299 = vmatpush.msrb.mxu1 %v287_v32  ;;  %v369_v12 = vld [vmem:[#allocation5 + $0x3c0] sm:$0xff] }
  0x37   :  { %181 = vmatpush.msra.mxu2 %v147_v51  ;;  %222 = vmatpush.msra.mxu3 %v192_v1  ;;  %v331_v51 = vld [vmem:[#allocation5 + $0x368] sm:$0xff] }
  0x38   :  { %257 = vmatpush.msrb.mxu0 %v243_v13  ;;  %300 = vmatpush.msrb.mxu1 %v286_v33  ;;  %v368_v13 = vld [vmem:[#allocation5 + $0x3b8] sm:$0xff] }
  0x39   :  { %182 = vmatpush.msra.mxu2 %v146_v52  ;;  %223 = vmatpush.msra.mxu3 %v191_v6  ;;  %v330_v52 = vld [vmem:[#allocation5 + $0x360] sm:$0xff]  ;;  %v375_v6 = vld [vmem:[#allocation5 + $0x3f0] sm:$0xff] }
  0x3a   :  { %258 = vmatpush.msrb.mxu0 %v242_v14  ;;  %301 = vmatpush.msrb.mxu1 %v285_v34  ;;  %v367_v14 = vld [vmem:[#allocation5 + $0x3b0] sm:$0xff] }
  0x3b   :  { %224 = vmatpush.msra.mxu3 %v190_v7  ;;  %v374_v7 = vld [vmem:[#allocation5 + $0x3e8] sm:$0xff] }
  0x3c   :  { %259 = vmatpush.msrb.mxu0 %v241_v15  ;;  %302 = vmatpush.msrb.mxu1 %v284_v35  ;;  %v366_v15 = vld [vmem:[#allocation5 + $0x3a8] sm:$0xff] }
  0x3d   :  { %225 = vmatpush.msra.mxu3 %v189_v8  ;;  %v373_v8 = vld [vmem:[#allocation5 + $0x3e0] sm:$0xff] }
  0x3e   :  { %260 = vmatpush.msrb.mxu0 %v240_v16  ;;  %303 = vmatpush.msrb.mxu1 %v283_v36  ;;  %v365_v16 = vld [vmem:[#allocation5 + $0x3a0] sm:$0xff] }
  0x40   :  { %261 = vmatpush.msrb.mxu0 %v239_v17  ;;  %304 = vmatpush.msrb.mxu1 %v282_v37  ;;  %v364_v17 = vld [vmem:[#allocation5 + $0x398] sm:$0xff] }
  0x42   :  { %262 = vmatpush.msrb.mxu0 %v238_v18  ;;  %305 = vmatpush.msrb.mxu1 %v281_v38  ;;  %v454_v18 = vld [vmem:[#allocation7 + $0x5] ss:$0 sm:$0xff] }
  0x44   :  { %263 = vmatpush.msrb.mxu0 %v237_v19  ;;  %306 = vmatpush.msrb.mxu1 %v280_v39 }
  0x46   :  { %264 = vmatpush.msrb.mxu0 %v236_v20  ;;  %307 = vmatpush.msrb.mxu1 %v279_v40 }
  0x48   :  { %265 = vmatpush.msrb.mxu0 %v235_v21  ;;  %308 = vmatpush.msrb.mxu1 %v278_v41 }
  0x4a   :  { %266 = vmatpush.msrb.mxu0 %v234_v26 }
  0x4c   :  { %267 = vmatpush.msrb.mxu0 %v233_v27 }
  0x4e   :  { %268 = vmatpush.msrb.mxu0 %v232_v28 }
  0xab   :  { %v98_v47 = vpop.f32.mrf.mxu0 }
  0xac   :  { %v99_v48 = vadd.f32 %v449_v46, %v98_v47  ;;  %v277_v46 = vld [vmem:[#allocation5 + $0x290] sm:$0xff]  ;;  %v276_v47 = vld [vmem:[#allocation5 + $0x288] sm:$0xff] }
  0xad   :  { %309 = vmatpush.msrb.mxu1 %v277_v46 }
  0xae   :  { %v101_v49 = vmax.f32 %v99_v48, 0.0  ;;  %v275_v48 = vld [vmem:[#allocation5 + $0x280] sm:$0xff] }
  0xaf   :  { %310 = vmatpush.msrb.mxu1 %v276_v47 }
  0xb0   :  { %140 = vmatmul.f32.vlgmr.msra.gmra.mxu1 %v101_v49  ;;  %v333_v49 = vld [vmem:[#allocation5 + $0x378] sm:$0xff] }
  0xb1   :  { %311 = vmatpush.msrb.mxu1 %v275_v48  ;;  %339 = vmatpush.msrb.mxu2 %v333_v49 }
  0xb3   :  { %340 = vmatpush.msrb.mxu2 %v332_v50 }
  0xb5   :  { %341 = vmatpush.msrb.mxu2 %v331_v51 }
  0xb7   :  { %342 = vmatpush.msrb.mxu2 %v330_v52 }
  0xb9   :  { %343 = vmatpush.msrb.mxu2 %v329_v53 }
  0xbb   :  { %344 = vmatpush.msrb.mxu2 %v328_v54 }
  0xbd   :  { %345 = vmatpush.msrb.mxu2 %v327_v55 }
  0xbf   :  { %346 = vmatpush.msrb.mxu2 %v326_v56 }
  0xc1   :  { %347 = vmatpush.msrb.mxu2 %v325_v57 }
  0xc3   :  { %348 = vmatpush.msrb.mxu2 %v324_v58 }
  0xc5   :  { %349 = vmatpush.msrb.mxu2 %v323_v59 }
  0xc7   :  { %350 = vmatpush.msrb.mxu2 %v322_v60 }
  0xc9   :  { %351 = vmatpush.msrb.mxu2 %v321_v61 }
 0x12d   :  { %v141_v3 = vpop.f32.mrf.mxu1 }
 0x12e   :  { %v142_v4 = vadd.f32 %v450_v2, %v141_v3  ;;  %v320_v2 = vld [vmem:[#allocation5 + $0x310] sm:$0xff]  ;;  %v319_v3 = vld [vmem:[#allocation5 + $0x308] sm:$0xff] }
 0x12f   :  { %352 = vmatpush.msrb.mxu2 %v320_v2 }
 0x130   :  { %v144_v5 = vmax.f32 %v142_v4, 0.0  ;;  %v318_v4 = vld [vmem:[#allocation5 + $0x300] sm:$0xff] }
 0x131   :  { %353 = vmatpush.msrb.mxu2 %v319_v3 }
 0x132   :  { %183 = vmatmul.f32.vlgmr.msra.gmra.mxu2 %v144_v5  ;;  %v376_v5 = vld [vmem:[#allocation5 + $0x3f8] sm:$0xff] }
 0x133   :  { %354 = vmatpush.msrb.mxu2 %v318_v4  ;;  %382 = vmatpush.msrb.mxu3 %v376_v5 }
 0x135   :  { %383 = vmatpush.msrb.mxu3 %v375_v6 }
 0x137   :  { %384 = vmatpush.msrb.mxu3 %v374_v7 }
 0x139   :  { %385 = vmatpush.msrb.mxu3 %v373_v8 }
 0x13b   :  { %386 = vmatpush.msrb.mxu3 %v372_v9 }
 0x13d   :  { %387 = vmatpush.msrb.mxu3 %v371_v10 }
 0x13f   :  { %388 = vmatpush.msrb.mxu3 %v370_v11 }
 0x141   :  { %389 = vmatpush.msrb.mxu3 %v369_v12 }
 0x143   :  { %390 = vmatpush.msrb.mxu3 %v368_v13 }
 0x145   :  { %391 = vmatpush.msrb.mxu3 %v367_v14 }
 0x147   :  { %392 = vmatpush.msrb.mxu3 %v366_v15 }
 0x149   :  { %393 = vmatpush.msrb.mxu3 %v365_v16 }
 0x14b   :  { %394 = vmatpush.msrb.mxu3 %v364_v17 }
 0x1b5   :  { %v184_v23 = vpop.f32.mrf.mxu2 }
 0x1b6   :  { %v185_v24 = vadd.f32 %v451_v22, %v184_v23  ;;  %v363_v22 = vld [vmem:[#allocation5 + $0x390] sm:$0xff]  ;;  %v362_v23 = vld [vmem:[#allocation5 + $0x388] sm:$0xff] }
 0x1b7   :  { %395 = vmatpush.msrb.mxu3 %v363_v22 }
 0x1b8   :  { %v187_v25 = vmax.f32 %v185_v24, 0.0  ;;  %v361_v24 = vld [vmem:[#allocation5 + $0x380] sm:$0xff] }
 0x1b9   :  { %396 = vmatpush.msrb.mxu3 %v362_v23 }
 0x1ba   :  { %226 = vmatmul.f32.vlgmr.msra.gmra.mxu3 %v187_v25  ;;  %v455_v25 = vld [vmem:[#allocation7 + $0x6] ss:$0 sm:$0xff] }
 0x1bb   :  { %397 = vmatpush.msrb.mxu3 %v361_v24 }
 0x23d   :  { %v227_v43 = vpop.f32.mrf.mxu3 }
 0x23e   :  { %v228_v44 = vadd.f32 %v452_v42, %v227_v43 }
 0x240   :  { %v230_v45 = vmax.f32 %v228_v44, 0.0 }
 0x242   :  { %269 = vmatmul.f32.vlgmr.msrb.gmra.mxu0 %v230_v45 }
 0x2bf   :  { %v270_v63 = vpop.f32.mrf.mxu0 }
 0x2c0   :  { %v271_v0 = vadd.f32 %v453_v62, %v270_v63 }
 0x2c2   :  { %v273_v1 = vmax.f32 %v271_v0, 0.0 }
 0x2c4   :  { %312 = vmatmul.f32.vlgmr.msrb.gmra.mxu1 %v273_v1 }
 0x341   :  { %v313_v19 = vpop.f32.mrf.mxu1 }
 0x342   :  { %v314_v20 = vadd.f32 %v454_v18, %v313_v19 }
 0x344   :  { %v316_v21 = vmax.f32 %v314_v20, 0.0 }
 0x346   :  { %355 = vmatmul.f32.vlgmr.msrb.gmra.mxu2 %v316_v21 }
 0x3c9   :  { %v356_v26 = vpop.f32.mrf.mxu2 }
 0x3ca   :  { %v357_v27 = vadd.f32 %v455_v25, %v356_v26 }
 0x3cc   :  { %v359_v28 = vmax.f32 %v357_v27, 0.0 }
 0x3ce   :  { %398 = vmatmul.f32.vlgmr.msrb.gmra.mxu3 %v359_v28 }
 0x451   :  { %v399_v30 = vpop.f32.mrf.mxu3 }
 0x452   :  { %v400_v31 = vadd.f32 %v456_v29, %v399_v30 }
 0x454   :  { %v440_v32 = vmul.f32 -1.442695, %v400_v31 }
 0x456   :  { %457 = vpow2.f32 %v440_v32 }
 0x45c   :  { %v458_v33 = vpop.eup %457 }
 0x45d   :  { %v405_v34 = vadd.f32 1.0, %v458_v33 }
 0x45f   :  { %459 = vrcp.f32 %v405_v34  ;;  %v417_v38 = vand.u32 2147483648, %v405_v34  ;;  %v415_v40 = vand.u32 2147483647, %v405_v34  ;;  %vm411_vm1 = vweird.f32 %v405_v34 }
 0x461   :  { %v418_v42 = vor.u32 1.1754944e-38, %v417_v38  ;;  %vm416_vm3 = vcmp.eq.f32.partialorder %v415_v40, 8.507059e+37 }
 0x465   :  { %v460_v35 = vpop.eup %459 }
 0x466   :  { %v407_v36 = vmul.f32 %v460_v35, %v405_v34  ;;  %vm412_vm0 = vweird.f32 %v460_v35 }
 0x467   :  { %vm413_vm2 = vmor %vm411_vm1, %vm412_vm0 }
 0x468   :  { %v408_v37 = vsub.f32 1.0, %v407_v36 }
 0x46a   :  { %v409_v39 = vmul.f32 %v460_v35, %v408_v37 }
 0x46c   :  { %v410_v41 = vadd.f32 %v460_v35, %v409_v39 }
 0x46e   :  { %v414_v43 = vsel %vm413_vm2, %v460_v35, %v410_v41 }
 0x46f   :  { %v419_v44 = vsel %vm416_vm3, %v418_v42, %v414_v43 }
 0x470   :  { %421 = vst [vmem:[#allocation8] sm:$0xff] %v419_v44 }
 0x471   :  { %432 = dma.vmem_to_hbm [thread:$0]  %s428_s2, 128, %s430_s5, [#allocation4]  }
 0x472   :  { %561 = dma.done.wait [#allocation4], 128  }
 0x473   :  { %562 = vsyncadd [#allocation4], 4294967168 }
 0x474   :  { %437 = vsyncpa [#allocation3], 1 }
 0x475   :  { %438 = vsyncpa [#allocation6], 1 }
 0x476   :  { %439 = vsyncpa [#allocation4], 1 }

</bundles_post_ra>
